<compile_context>
chip_gen: v6e
topology: v6e:2x2x1
jax: 0.10.0
libtpu: 0.0.40
codegen_flags: <defaults>
</compile_context>

<pallas_src>
import numpy as np
import jax
import jax.numpy as jnp
from jax.experimental import pallas as pl
from jax.experimental.pallas import tpu as pltpu

EPS = 1e-5
LANE = 128            # pad K and C_out to multiples of this (lane-dense stores)

_VMEM_BUDGET = None


def _vmem_budget():
    """Per-generation scoped-VMEM budget (bytes)."""
    global _VMEM_BUDGET
    if _VMEM_BUDGET is None:
        try:
            cap = int(pltpu.get_tpu_info().vmem_capacity_bytes)
        except Exception:
            cap = 64 * 1024 * 1024          # conservative fallback (v7x-sized)
        # ~45 MiB on 64-MiB parts (v7x), ~90 MiB on 128-MiB parts (v5e/v6e).
        _VMEM_BUDGET = int(min(0.7 * cap, 100 * 1024 * 1024))
    return _VMEM_BUDGET


def _round_up(x, m):
    return (x + m - 1) // m * m


def _pad2d(x, rows, cols):
    r, c = x.shape
    return jnp.pad(x, ((0, rows - r), (0, cols - c)))


def _choose_tile(m_true, reqs, budget):
    """Pick the largest M tile whose double-buffered working set fits `budget`.

    reqs: list of (streamed_bytes_per_row, resident_bytes) over all kernels
    that will share this row space."""
    cap = _round_up(max(min(m_true, 1024), 1), 256)
    for cand in (1024, 768, 512, 256):
        if cand > cap:
            continue
        if all(2 * cand * s + 2 * r + (2 << 20) <= budget for s, r in reqs):
            return cand
    return 256


# ----------------------------------------------------------------------------
# Pass 1: global batch-norm statistics  ->  per-column (scale, shift)
# Optionally also emits the pre-BN matmul result (bf16, M-tiled) so the apply
# pass for wide-K convs can be a matmul-free FMA sweep.
# ----------------------------------------------------------------------------
def _make_stats_kernel(m_true: int, emit_preact: bool):
    inv_m = 1.0 / float(m_true)

    def kernel(*refs):
        if emit_preact:
            (p_ref, w_ref, g_ref, b_ref,
             scale_ref, shift_ref, y_ref, sum_ref, sq_ref) = refs
        else:
            (p_ref, w_ref, g_ref, b_ref,
             scale_ref, shift_ref, sum_ref, sq_ref) = refs
        i = pl.program_id(0)

        @pl.when(i == 0)
        def _():
            sum_ref[...] = jnp.zeros_like(sum_ref)
            sq_ref[...] = jnp.zeros_like(sq_ref)

        y = jnp.dot(p_ref[...], w_ref[...], preferred_element_type=jnp.float32)
        sum_ref[...] += jnp.sum(y, axis=0, keepdims=True)
        sq_ref[...] += jnp.sum(y * y, axis=0, keepdims=True)
        if emit_preact:
            y_ref[...] = y.astype(y_ref.dtype)

        @pl.when(i == pl.num_programs(0) - 1)
        def _():
            mu = sum_ref[...] * inv_m
            var = jnp.maximum(sq_ref[...] * inv_m - mu * mu, 0.0)  # clamp
            scale = g_ref[...] * jax.lax.rsqrt(var + EPS)
            scale_ref[...] = scale
            shift_ref[...] = b_ref[...] - mu * scale

    return kernel


def bn_stats(patches, w, gamma, beta, m_true, m_tile, budget, emit_preact=False):
    """patches: (M_pad, K_pad) bf16, w: (K_pad, C_pad) bf16, gamma/beta (1, C_pad).
    Returns (scale, shift[, y_pre_bf16]) for y_norm = y*scale + shift."""
    m_pad, k_pad = patches.shape
    c_pad = w.shape[1]
    mt = m_pad // m_tile

    out_shape = [jax.ShapeDtypeStruct((1, c_pad), jnp.float32),
                 jax.ShapeDtypeStruct((1, c_pad), jnp.float32)]
    out_specs = [pl.BlockSpec((1, c_pad), lambda i: (0, 0)),
                 pl.BlockSpec((1, c_pad), lambda i: (0, 0))]
    if emit_preact:
        out_shape.append(jax.ShapeDtypeStruct((m_pad, c_pad), jnp.bfloat16))
        out_specs.append(pl.BlockSpec((m_tile, c_pad), lambda i: (i, 0)))

    return pl.pallas_call(
        _make_stats_kernel(m_true, emit_preact),
        out_shape=tuple(out_shape),
        grid=(mt,),
        in_specs=[
            pl.BlockSpec((m_tile, k_pad), lambda i: (i, 0)),
            pl.BlockSpec((k_pad, c_pad), lambda i: (0, 0)),
            pl.BlockSpec((1, c_pad), lambda i: (0, 0)),
            pl.BlockSpec((1, c_pad), lambda i: (0, 0)),
        ],
        out_specs=tuple(out_specs),
        scratch_shapes=[pltpu.VMEM((1, c_pad), jnp.float32),
                        pltpu.VMEM((1, c_pad), jnp.float32)],
        compiler_params=pltpu.CompilerParams(
            dimension_semantics=("arbitrary",),
            vmem_limit_bytes=budget,
        ),
    )(patches, w, gamma, beta)


# Fused stats for conv3 + shortcut conv (same row space, one pipeline).
def _make_stats2_kernel(m_true: int):
    inv_m = 1.0 / float(m_true)

    def kernel(p_ref, w_ref, g_ref, b_ref, p2_ref, w2_ref, g2_ref, b2_ref,
               sc_ref, sh_ref, sc2_ref, sh2_ref,
               sum_ref, sq_ref, sum2_ref, sq2_ref):
        i = pl.program_id(0)

        @pl.when(i == 0)
        def _():
            sum_ref[...] = jnp.zeros_like(sum_ref)
            sq_ref[...] = jnp.zeros_like(sq_ref)
            sum2_ref[...] = jnp.zeros_like(sum2_ref)
            sq2_ref[...] = jnp.zeros_like(sq2_ref)

        y = jnp.dot(p_ref[...], w_ref[...], preferred_element_type=jnp.float32)
        sum_ref[...] += jnp.sum(y, axis=0, keepdims=True)
        sq_ref[...] += jnp.sum(y * y, axis=0, keepdims=True)
        y2 = jnp.dot(p2_ref[...], w2_ref[...], preferred_element_type=jnp.float32)
        sum2_ref[...] += jnp.sum(y2, axis=0, keepdims=True)
        sq2_ref[...] += jnp.sum(y2 * y2, axis=0, keepdims=True)

        @pl.when(i == pl.num_programs(0) - 1)
        def _():
            mu = sum_ref[...] * inv_m
            var = jnp.maximum(sq_ref[...] * inv_m - mu * mu, 0.0)
            s = g_ref[...] * jax.lax.rsqrt(var + EPS)
            sc_ref[...] = s
            sh_ref[...] = b_ref[...] - mu * s
            mu2 = sum2_ref[...] * inv_m
            var2 = jnp.maximum(sq2_ref[...] * inv_m - mu2 * mu2, 0.0)
            s2 = g2_ref[...] * jax.lax.rsqrt(var2 + EPS)
            sc2_ref[...] = s2
            sh2_ref[...] = b2_ref[...] - mu2 * s2

    return kernel


def bn_stats2(p, w, g, b, p2, w2, g2, b2, m_true, m_tile, budget):
    m_pad, k_pad = p.shape
    c_pad = w.shape[1]
    k2 = p2.shape[1]
    mt = m_pad // m_tile

    stat_spec = pl.BlockSpec((1, c_pad), lambda i: (0, 0))
    return pl.pallas_call(
        _make_stats2_kernel(m_true),
        out_shape=tuple(jax.ShapeDtypeStruct((1, c_pad), jnp.float32)
                        for _ in range(4)),
        grid=(mt,),
        in_specs=[
            pl.BlockSpec((m_tile, k_pad), lambda i: (i, 0)),
            pl.BlockSpec((k_pad, c_pad), lambda i: (0, 0)),
            stat_spec, stat_spec,
            pl.BlockSpec((m_tile, k2), lambda i: (i, 0)),
            pl.BlockSpec((k2, c_pad), lambda i: (0, 0)),
            stat_spec, stat_spec,
        ],
        out_specs=(stat_spec, stat_spec, stat_spec, stat_spec),
        scratch_shapes=[pltpu.VMEM((1, c_pad), jnp.float32)] * 4,
        compiler_params=pltpu.CompilerParams(
            dimension_semantics=("arbitrary",),
            vmem_limit_bytes=budget,
        ),
    )(p, w, g, b, p2, w2, g2, b2)


# ----------------------------------------------------------------------------
# Apply passes
# ----------------------------------------------------------------------------
def _make_apply_kernel(has_second: bool, has_residual: bool, apply_relu: bool):
    """matmul -> y*scale+shift -> [fused shortcut conv | residual] -> [ReLU]."""
    def kernel(*refs):
        p_ref, w_ref, sc_ref, sh_ref = refs[:4]
        idx = 4
        if has_second:
            p2_ref, w2_ref, sc2_ref, sh2_ref = refs[4:8]
            idx = 8
        if has_residual:
            res_ref = refs[idx]
            idx += 1
        out_ref = refs[idx]

        y = jnp.dot(p_ref[...], w_ref[...], preferred_element_type=jnp.float32)
        y = y * sc_ref[...] + sh_ref[...]
        if has_second:
            y2 = jnp.dot(p2_ref[...], w2_ref[...],
                         preferred_element_type=jnp.float32)
            y = y + (y2 * sc2_ref[...] + sh2_ref[...])
        if has_residual:
            y = y + res_ref[...].astype(jnp.float32)
        if apply_relu:
            y = jnp.maximum(y, 0.0)
        out_ref[...] = y.astype(out_ref.dtype)

    return kernel


def bn_matmul_apply(patches, w, scale, shift, m_tile, budget, second=None,
                    residual=None, apply_relu=True, out_dtype=jnp.bfloat16):
    """Normalized conv (+ fused shortcut conv or residual add, + ReLU)."""
    m_pad, k_pad = patches.shape
    c_pad = w.shape[1]
    mt = m_pad // m_tile

    inputs = [patches, w, scale, shift]
    in_specs = [
        pl.BlockSpec((m_tile, k_pad), lambda i: (i, 0)),
        pl.BlockSpec((k_pad, c_pad), lambda i: (0, 0)),
        pl.BlockSpec((1, c_pad), lambda i: (0, 0)),
        pl.BlockSpec((1, c_pad), lambda i: (0, 0)),
    ]
    if second is not None:
        p2, w2, sc2, sh2 = second
        k2 = p2.shape[1]
        inputs += [p2, w2, sc2, sh2]
        in_specs += [
            pl.BlockSpec((m_tile, k2), lambda i: (i, 0)),
            pl.BlockSpec((k2, c_pad), lambda i: (0, 0)),
            pl.BlockSpec((1, c_pad), lambda i: (0, 0)),
            pl.BlockSpec((1, c_pad), lambda i: (0, 0)),
        ]
    if residual is not None:
        inputs.append(residual)
        in_specs.append(pl.BlockSpec((m_tile, c_pad), lambda i: (i, 0)))

    return pl.pallas_call(
        _make_apply_kernel(second is not None, residual is not None, apply_relu),
        out_shape=jax.ShapeDtypeStruct((m_pad, c_pad), out_dtype),
        grid=(mt,),
        in_specs=in_specs,
        out_specs=pl.BlockSpec((m_tile, c_pad), lambda i: (i, 0)),
        compiler_params=pltpu.CompilerParams(
            dimension_semantics=("parallel",),   # megacore sharding on v7x
            vmem_limit_bytes=budget,
        ),
    )(*inputs)


def _make_affine_kernel(m_true: int, m_tile: int, mask_tail: bool):
    """VPU-only: y_pre*scale + shift -> ReLU -> zero padded tail rows."""
    def kernel(y_ref, sc_ref, sh_ref, o_ref):
        y = y_ref[...].astype(jnp.float32) * sc_ref[...] + sh_ref[...]
        y = jnp.maximum(y, 0.0)
        if mask_tail:
            rows = (jax.lax.broadcasted_iota(jnp.int32, y.shape, 0)
                    + pl.program_id(0) * m_tile)
            y = jnp.where(rows < m_true, y, 0.0)
        o_ref[...] = y.astype(o_ref.dtype)

    return kernel


def bn_affine_apply(y_pre, scale, shift, m_true, m_tile, budget):
    """Matmul-free BN apply over a stored pre-activation; output is a valid
    (zero-padded) patch matrix ready to feed a following 1x1 conv kernel."""
    m_pad, c_pad = y_pre.shape
    mt = m_pad // m_tile
    return pl.pallas_call(
        _make_affine_kernel(m_true, m_tile, m_pad != m_true),
        out_shape=jax.ShapeDtypeStruct((m_pad, c_pad), jnp.bfloat16),
        grid=(mt,),
        in_specs=[pl.BlockSpec((m_tile, c_pad), lambda i: (i, 0)),
                  pl.BlockSpec((1, c_pad), lambda i: (0, 0)),
                  pl.BlockSpec((1, c_pad), lambda i: (0, 0))],
        out_specs=pl.BlockSpec((m_tile, c_pad), lambda i: (i, 0)),
        compiler_params=pltpu.CompilerParams(
            dimension_semantics=("parallel",),
            vmem_limit_bytes=budget,
        ),
    )(y_pre, scale, shift)


# ----------------------------------------------------------------------------
# JAX glue: CondConv2d masking, weight prep, im2col
# ----------------------------------------------------------------------------
def cond_masked_weight(w, k):
    """Apply CondConv2d mask and zero filters >= k (= layer's in_channels)."""
    c_out, c_in = w.shape[0], w.shape[1]
    filt_in = np.round(np.linspace(1.0, float(c_in), c_out)).astype(np.int64)
    mask = np.zeros((c_out, c_in), dtype=np.float32)
    for i, n_in in enumerate(filt_in):
        mask[i, : int(n_in)] = 1.0
    mask[k:, :] = 0.0  # weight[self._k:] = 0.0
    return w * jnp.asarray(mask)[:, :, None, None]


def _prep_weight(w):
    """(C_out, C_in, KH, KW) -> lane-padded (K_pad, C_pad) bf16 (im2col order)."""
    c_out, c_in, kh, kw = w.shape
    w_flat = jnp.transpose(w, (2, 3, 1, 0)).reshape(kh * kw * c_in, c_out)
    w_flat = _pad2d(w_flat, _round_up(kh * kw * c_in, LANE), _round_up(c_out, LANE))
    return w_flat.astype(jnp.bfloat16)


def im2col(x, kh, kw, stride, pad):
    """x: NHWC -> (N*Ho*Wo, KH*KW*C) patch matrix plus output spatial dims."""
    n, h, w_, c = x.shape
    ho = (h + 2 * pad - kh) // stride + 1
    wo = (w_ + 2 * pad - kw) // stride + 1
    xp = jnp.pad(x, ((0, 0), (pad, pad), (pad, pad), (0, 0)))
    cols = []
    for i in range(kh):
        for j in range(kw):
            cols.append(
                xp[:, i: i + (ho - 1) * stride + 1: stride,
                      j: j + (wo - 1) * stride + 1: stride, :]
            )
    patches = jnp.concatenate(cols, axis=-1)
    return patches.reshape(n * ho * wo, kh * kw * c), (n, ho, wo)


# ----------------------------------------------------------------------------
# CondBottleneck
# ----------------------------------------------------------------------------
class CondBottleneckPallas:
    expansion = 4

    def __init__(self, in_planes, planes, stride=1, *, key):
        self.stride = stride
        self.in_planes = in_planes
        self.planes = planes
        out_planes = self.expansion * planes
        self.out_planes = out_planes
        keys = jax.random.split(key, 4)

        def conv_w(k, c_out, c_in, ksz):
            fan_in = c_in * ksz * ksz
            bound = 1.0 / np.sqrt(fan_in)
            return jax.random.uniform(
                k, (c_out, c_in, ksz, ksz), jnp.float32, -bound, bound)

        # masked f32 weights (kept for the pure-JAX reference)
        self.w1 = cond_masked_weight(conv_w(keys[0], planes, in_planes, 1), in_planes)
        self.w2 = cond_masked_weight(conv_w(keys[1], planes, planes, 3), planes)
        self.w3 = cond_masked_weight(conv_w(keys[2], out_planes, planes, 1), planes)

        self.has_shortcut = stride != 1 or in_planes != out_planes
        if self.has_shortcut:
            self.ws = cond_masked_weight(
                conv_w(keys[3], out_planes, in_planes, 1), in_planes)

        # Pallas-path parameters: flattened / lane-padded / bf16, prepared once.
        self.w1_p = _prep_weight(self.w1)
        self.w2_p = _prep_weight(self.w2)
        self.w3_p = _prep_weight(self.w3)
        c1p = _round_up(planes, LANE)
        c3p = _round_up(out_planes, LANE)
        # nn.BatchNorm2d default init: gamma = 1, beta = 0 (padded columns are
        # harmless: their conv output is exactly zero, stats are per-column).
        self.g1_p, self.b1_p = jnp.ones((1, c1p)), jnp.zeros((1, c1p))
        self.g2_p, self.b2_p = jnp.ones((1, c1p)), jnp.zeros((1, c1p))
        self.g3_p, self.b3_p = jnp.ones((1, c3p)), jnp.zeros((1, c3p))
        if self.has_shortcut:
            self.ws_p = _prep_weight(self.ws)
            self.gs_p, self.bs_p = jnp.ones((1, c3p)), jnp.zeros((1, c3p))

    # ------------------------------------------------------------------ Pallas
    def _forward_pallas(self, x_nchw):
        x = jnp.transpose(x_nchw, (0, 2, 3, 1)).astype(jnp.float32)  # NCHW->NHWC
        n, h, w_, c = x.shape
        x_bf = x.astype(jnp.bfloat16)
        budget = _vmem_budget()

        k1, c1p = self.w1_p.shape
        k2 = self.w2_p.shape[0]
        k3, c3p = self.w3_p.shape
        ks = self.ws_p.shape[0] if self.has_shortcut else 0

        # ------------------------------- conv1 (1x1) + bn1 + relu
        p1, (n1, h1, w1) = im2col(x_bf, 1, 1, 1, 0)
        m1 = p1.shape[0]
        tile1 = _choose_tile(
            m1,
            [(k1 * 2, k1 * c1p * 2),                 # stats
             ((k1 + c1p) * 2, k1 * c1p * 2)],        # apply (matmul recompute)
            budget)
        p1 = _pad2d(p1, _round_up(m1, tile1), k1)
        sc1, sh1 = bn_stats(p1, self.w1_p, self.g1_p, self.b1_p, m1, tile1, budget)
        y1 = bn_matmul_apply(p1, self.w1_p, sc1, sh1, tile1, budget,
                             apply_relu=True, out_dtype=jnp.bfloat16)
        y1 = y1[:m1, :self.planes].reshape(n1, h1, w1, self.planes)

        # ------------------------------- stage-2 row space (conv2/conv3/shortcut)
        p2, (n2, h2, w2) = im2col(y1, 3, 3, self.stride, 1)
        m2 = p2.shape[0]
        reqs2 = [
            ((k2 + c1p) * 2, k2 * c1p * 2),          # conv2 stats (+ pre-act out)
            (4 * c1p, 0),                            # conv2 affine apply
        ]
        if self.has_shortcut:
            reqs2 += [((k3 + ks) * 2, (k3 + ks) * c3p * 2),          # fused stats
                      ((k3 + ks + c3p) * 2, (k3 + ks) * c3p * 2)]    # fused apply
        else:
            reqs2 += [(k3 * 2, k3 * c3p * 2),
                      ((k3 + 2 * c3p) * 2, k3 * c3p * 2)]            # apply + resid
        tile2 = _choose_tile(m2, reqs2, budget)
        m2_pad = _round_up(m2, tile2)

        # conv2 (3x3, stride, pad=1) + bn2 + relu
        #   stats pass also emits the pre-BN matmul (bf16); apply is VPU-only
        #   and zeroes padded tail rows so its output is directly the conv3
        #   patch matrix (no slice / reshape / re-pad HBM round-trip).
        p2 = _pad2d(p2, m2_pad, k2)
        sc2, sh2, y2_pre = bn_stats(p2, self.w2_p, self.g2_p, self.b2_p,
                                    m2, tile2, budget, emit_preact=True)
        y2 = bn_affine_apply(y2_pre, sc2, sh2, m2, tile2, budget)  # (m2_pad, c1p)

        # conv3 (1x1) + bn3 + shortcut + relu
        if self.has_shortcut:
            ps, _ = im2col(x_bf, 1, 1, self.stride, 0)
            ps = _pad2d(ps, m2_pad, ks)
            sc3, sh3, scs, shs = bn_stats2(
                y2, self.w3_p, self.g3_p, self.b3_p,
                ps, self.ws_p, self.gs_p, self.bs_p, m2, tile2, budget)
            out = bn_matmul_apply(y2, self.w3_p, sc3, sh3, tile2, budget,
                                  second=(ps, self.ws_p, scs, shs),
                                  apply_relu=True, out_dtype=jnp.bfloat16)
        else:
            sc3, sh3 = bn_stats(y2, self.w3_p, self.g3_p, self.b3_p,
                                m2, tile2, budget)
            res = _pad2d(x_bf.reshape(n * h * w_, c), m2_pad, c3p)
            out = bn_matmul_apply(y2, self.w3_p, sc3, sh3, tile2, budget,
                                  residual=res, apply_relu=True,
                                  out_dtype=jnp.bfloat16)

        out = out[:m2, :self.out_planes].reshape(n2, h2, w2, self.out_planes)
        # NHWC -> NCHW; cast back to f32 to keep the module's interface dtype.
        return jnp.transpose(out, (0, 3, 1, 2)).astype(jnp.float32)

    # --------------------------------------------------------------- reference
    def _forward_ref(self, x_nchw):
        x = jnp.transpose(x_nchw, (0, 2, 3, 1)).astype(jnp.float32)
        n, h, w_, c = x.shape

        def conv_bn(x_nhwc, w, stride, pad, apply_relu, residual=None):
            kh, kw = w.shape[2], w.shape[3]
            p, (nn_, ho, wo) = im2col(x_nhwc, kh, kw, stride, pad)
            w_flat = jnp.transpose(w, (2, 3, 1, 0)).reshape(
                kh * kw * w.shape[1], w.shape[0])
            y = jnp.dot(p, w_flat, preferred_element_type=jnp.float32)
            mu = jnp.mean(y, axis=0, keepdims=True)
            var = jnp.mean(jnp.square(y - mu), axis=0, keepdims=True)
            y = (y - mu) * jax.lax.rsqrt(var + EPS)   # gamma=1, beta=0
            if residual is not None:
                y = y + residual
            if apply_relu:
                y = jnp.maximum(y, 0.0)
            return y.reshape(nn_, ho, wo, -1)

        y1 = conv_bn(x, self.w1, 1, 0, True)
        y2 = conv_bn(y1, self.w2, self.stride, 1, True)
        if self.has_shortcut:
            sc = conv_bn(x, self.ws, self.stride, 0, False)
            sc = sc.reshape(-1, self.out_planes)
        else:
            sc = x.reshape(-1, self.out_planes)
        out = conv_bn(y2, self.w3, 1, 0, True, residual=sc)
        return jnp.transpose(out, (0, 3, 1, 2))

    def __call__(self, x_nchw, use_pallas=True):
        if use_pallas:
            return self._forward_pallas(x_nchw)
        return self._forward_ref(x_nchw)


# TODO(synk): the 'benchmark' execution mode of CondConv2d (per-filter python
# loop over sliced convs) is not implemented; only the default 'standard' mode
# (numerically equivalent) is reproduced.

if __name__ == "__main__":
    key = jax.random.PRNGKey(0)
    k_x, k_p1, k_p2 = jax.random.split(key, 3)

    # Config A: projection shortcut (stride=2, in_planes != expansion*planes)
    N, IN_PLANES, PLANES, STRIDE, H, W = 2, 8, 4, 2, 16, 16
    x = jax.random.normal(k_x, (N, IN_PLANES, H, W), jnp.float32)  # NCHW input
    block = CondBottleneckPallas(IN_PLANES, PLANES, stride=STRIDE, key=k_p1)

    out = jax.block_until_ready(block(x, use_pallas=True))
    ref = jax.block_until_ready(block(x, use_pallas=False))
    expected = (N, CondBottleneckPallas.expansion * PLANES, H // STRIDE, W // STRIDE)
    assert out.shape == expected, (out.shape, expected)
    assert bool(jnp.all(jnp.isfinite(out)))
    assert np.allclose(np.asarray(out), np.asarray(ref), rtol=5e-2, atol=5e-2), (
        float(jnp.max(jnp.abs(out - ref))))

    # Config B: identity shortcut (stride=1, in_planes == expansion*planes)
    x2 = jax.random.normal(k_x, (N, 16, H, W), jnp.float32)
    block2 = CondBottleneckPallas(16, 4, stride=1, key=k_p2)
    out2 = jax.block_until_ready(block2(x2, use_pallas=True))
    ref2 = jax.block_until_ready(block2(x2, use_pallas=False))
    assert out2.shape == (N, 16, H, W), out2.shape
    assert bool(jnp.all(jnp.isfinite(out2)))
    assert np.allclose(np.asarray(out2), np.asarray(ref2), rtol=5e-2, atol=5e-2), (
        float(jnp.max(jnp.abs(out2 - ref2))))

    print("KERNEL_OK")
</pallas_src>

<mosaic_0001>
module attributes {stable_mosaic.version = 11 : i64} {
  func.func @kernel(%arg0: i32, %arg1: memref<512x128xbf16, #tpu.memory_space<vmem>>, %arg2: memref<128x128xbf16, #tpu.memory_space<vmem>>, %arg3: memref<1x128xf32, #tpu.memory_space<vmem>>, %arg4: memref<1x128xf32, #tpu.memory_space<vmem>>, %arg5: memref<1x128xf32, #tpu.memory_space<vmem>>, %arg6: memref<1x128xf32, #tpu.memory_space<vmem>>, %arg7: memref<1x128xf32, #tpu.memory_space<vmem>>, %arg8: memref<1x128xf32, #tpu.memory_space<vmem>>) attributes {dimension_semantics = [#tpu.dimension_semantics<arbitrary>], iteration_bounds = array<i64: 1>, scalar_prefetch = 0 : i64, scratch_operands = 2 : i64, tpu.core_type = #tpu.core_type<tc>, window_params = [{transform_indices = @transform_0, window_bounds = array<i64: 512, 128>}, {pipeline_mode = #tpu.pipeline_mode<synchronous>, transform_indices = @transform_1, window_bounds = array<i64: 128, 128>}, {pipeline_mode = #tpu.pipeline_mode<synchronous>, transform_indices = @transform_2, window_bounds = array<i64: 1, 128>}, {pipeline_mode = #tpu.pipeline_mode<synchronous>, transform_indices = @transform_3, window_bounds = array<i64: 1, 128>}, {pipeline_mode = #tpu.pipeline_mode<synchronous>, transform_indices = @transform_4, window_bounds = array<i64: 1, 128>}, {pipeline_mode = #tpu.pipeline_mode<synchronous>, transform_indices = @transform_5, window_bounds = array<i64: 1, 128>}]} {
    %c0_i32 = arith.constant 0 : i32
    %0 = arith.cmpi eq, %arg0, %c0_i32 : i32
    %1 = arith.extui %0 : i1 to i32
    %c0_i32_0 = arith.constant 0 : i32
    %2 = arith.cmpi ne, %1, %c0_i32_0 : i32
    scf.if %2 {
      %cst_16 = arith.constant 0.000000e+00 : f32
      %20 = vector.broadcast %cst_16 : f32 to vector<1x128xf32>
      %c0_17 = arith.constant 0 : index
      %c0_18 = arith.constant 0 : index
      %21 = vector.load %arg7[%c0_17, %c0_18] : memref<1x128xf32, #tpu.memory_space<vmem>>, vector<1x128xf32>
      tpu.vector_store %arg7[%c0_17, %c0_18], %20 {strides = array<i32>} : memref<1x128xf32, #tpu.memory_space<vmem>>, vector<1x128xf32>,
      %cst_19 = arith.constant 0.000000e+00 : f32
      %22 = vector.broadcast %cst_19 : f32 to vector<1x128xf32>
      %c0_20 = arith.constant 0 : index
      %c0_21 = arith.constant 0 : index
      %23 = vector.load %arg8[%c0_20, %c0_21] : memref<1x128xf32, #tpu.memory_space<vmem>>, vector<1x128xf32>
      tpu.vector_store %arg8[%c0_20, %c0_21], %22 {strides = array<i32>} : memref<1x128xf32, #tpu.memory_space<vmem>>, vector<1x128xf32>,
    } else {
    }
    %c0 = arith.constant 0 : index
    %c0_1 = arith.constant 0 : index
    %3 = vector.load %arg1[%c0, %c0_1] : memref<512x128xbf16, #tpu.memory_space<vmem>>, vector<512x128xbf16>
    %c0_2 = arith.constant 0 : index
    %c0_3 = arith.constant 0 : index
    %4 = vector.load %arg2[%c0_2, %c0_3] : memref<128x128xbf16, #tpu.memory_space<vmem>>, vector<128x128xbf16>
    %cst = arith.constant dense<0.000000e+00> : vector<512x128xf32>
    %5 = tpu.matmul %3, %4, %cst {dimension_numbers = #tpu.dot_dimension_numbers<[1], [0], [0], [1], [0, 0, 1, 1], [], []>} : vector<512x128xbf16>, vector<128x128xbf16>, vector<512x128xf32> -> vector<512x128xf32>
    %c0_4 = arith.constant 0 : index
    %c0_5 = arith.constant 0 : index
    %6 = vector.load %arg7[%c0_4, %c0_5] : memref<1x128xf32, #tpu.memory_space<vmem>>, vector<1x128xf32>
    %cst_6 = arith.constant dense<0.000000e+00> : vector<128xf32>
    %7 = vector.multi_reduction <add>, %5, %cst_6 [0] : vector<512x128xf32> to vector<128xf32>
    %8 = vector.shape_cast %7 : vector<128xf32> to vector<1x128xf32>
    %9 = arith.addf %6, %8 : vector<1x128xf32>
    %c0_7 = arith.constant 0 : index
    %c0_8 = arith.constant 0 : index
    %10 = vector.load %arg7[%c0_7, %c0_8] : memref<1x128xf32, #tpu.memory_space<vmem>>, vector<1x128xf32>
    tpu.vector_store %arg7[%c0_7, %c0_8], %9 {strides = array<i32>} : memref<1x128xf32, #tpu.memory_space<vmem>>, vector<1x128xf32>,
    %c0_9 = arith.constant 0 : index
    %c0_10 = arith.constant 0 : index
    %11 = vector.load %arg8[%c0_9, %c0_10] : memref<1x128xf32, #tpu.memory_space<vmem>>, vector<1x128xf32>
    %12 = arith.mulf %5, %5 : vector<512x128xf32>
    %cst_11 = arith.constant dense<0.000000e+00> : vector<128xf32>
    %13 = vector.multi_reduction <add>, %12, %cst_11 [0] : vector<512x128xf32> to vector<128xf32>
    %14 = vector.shape_cast %13 : vector<128xf32> to vector<1x128xf32>
    %15 = arith.addf %11, %14 : vector<1x128xf32>
    %c0_12 = arith.constant 0 : index
    %c0_13 = arith.constant 0 : index
    %16 = vector.load %arg8[%c0_12, %c0_13] : memref<1x128xf32, #tpu.memory_space<vmem>>, vector<1x128xf32>
    tpu.vector_store %arg8[%c0_12, %c0_13], %15 {strides = array<i32>} : memref<1x128xf32, #tpu.memory_space<vmem>>, vector<1x128xf32>,
    %c0_i32_14 = arith.constant 0 : i32
    %17 = arith.cmpi eq, %arg0, %c0_i32_14 : i32
    %18 = arith.extui %17 : i1 to i32
    %c0_i32_15 = arith.constant 0 : i32
    %19 = arith.cmpi ne, %18, %c0_i32_15 : i32
    scf.if %19 {
      %c0_16 = arith.constant 0 : index
      %c0_17 = arith.constant 0 : index
      %20 = vector.load %arg7[%c0_16, %c0_17] : memref<1x128xf32, #tpu.memory_space<vmem>>, vector<1x128xf32>
      %cst_18 = arith.constant 0.001953125 : f32
      %21 = vector.broadcast %cst_18 : f32 to vector<1x128xf32>
      %22 = arith.mulf %20, %21 : vector<1x128xf32>
      %c0_19 = arith.constant 0 : index
      %c0_20 = arith.constant 0 : index
      %23 = vector.load %arg8[%c0_19, %c0_20] : memref<1x128xf32, #tpu.memory_space<vmem>>, vector<1x128xf32>
      %cst_21 = arith.constant 0.001953125 : f32
      %24 = vector.broadcast %cst_21 : f32 to vector<1x128xf32>
      %25 = arith.mulf %23, %24 : vector<1x128xf32>
      %26 = arith.mulf %22, %22 : vector<1x128xf32>
      %27 = arith.subf %25, %26 : vector<1x128xf32>
      %cst_22 = arith.constant 0.000000e+00 : f32
      %28 = vector.broadcast %cst_22 : f32 to vector<1x128xf32>
      %29 = arith.maximumf %27, %28 : vector<1x128xf32>
      %c0_23 = arith.constant 0 : index
      %c0_24 = arith.constant 0 : index
      %30 = vector.load %arg3[%c0_23, %c0_24] : memref<1x128xf32, #tpu.memory_space<vmem>>, vector<1x128xf32>
      %cst_25 = arith.constant 9.99999974E-6 : f32
      %31 = vector.broadcast %cst_25 : f32 to vector<1x128xf32>
      %32 = arith.addf %29, %31 : vector<1x128xf32>
      %33 = math.rsqrt %32 : vector<1x128xf32>
      %34 = arith.mulf %30, %33 : vector<1x128xf32>
      %c0_26 = arith.constant 0 : index
      %c0_27 = arith.constant 0 : index
      %35 = vector.load %arg5[%c0_26, %c0_27] : memref<1x128xf32, #tpu.memory_space<vmem>>, vector<1x128xf32>
      tpu.vector_store %arg5[%c0_26, %c0_27], %34 {strides = array<i32>} : memref<1x128xf32, #tpu.memory_space<vmem>>, vector<1x128xf32>,
      %c0_28 = arith.constant 0 : index
      %c0_29 = arith.constant 0 : index
      %36 = vector.load %arg4[%c0_28, %c0_29] : memref<1x128xf32, #tpu.memory_space<vmem>>, vector<1x128xf32>
      %37 = arith.mulf %22, %34 : vector<1x128xf32>
      %38 = arith.subf %36, %37 : vector<1x128xf32>
      %c0_30 = arith.constant 0 : index
      %c0_31 = arith.constant 0 : index
      %39 = vector.load %arg6[%c0_30, %c0_31] : memref<1x128xf32, #tpu.memory_space<vmem>>, vector<1x128xf32>
      tpu.vector_store %arg6[%c0_30, %c0_31], %38 {strides = array<i32>} : memref<1x128xf32, #tpu.memory_space<vmem>>, vector<1x128xf32>,
    } else {
    }
    return
  }
  func.func @transform_0(%arg0: i32) -> (i32, i32) {
    %c0_i32 = arith.constant 0 : i32
    %c0_i32_0 = arith.constant 0 : i32
    return %arg0, %c0_i32 : i32, i32
  }
  func.func @transform_1(%arg0: i32) -> (i32, i32) {
    %c0_i32 = arith.constant 0 : i32
    %c0_i32_0 = arith.constant 0 : i32
    %c0_i32_1 = arith.constant 0 : i32
    return %c0_i32, %c0_i32_0 : i32, i32
  }
  func.func @transform_2(%arg0: i32) -> (i32, i32) {
    %c0_i32 = arith.constant 0 : i32
    %c0_i32_0 = arith.constant 0 : i32
    %c0_i32_1 = arith.constant 0 : i32
    return %c0_i32, %c0_i32_0 : i32, i32
  }
  func.func @transform_3(%arg0: i32) -> (i32, i32) {
    %c0_i32 = arith.constant 0 : i32
    %c0_i32_0 = arith.constant 0 : i32
    %c0_i32_1 = arith.constant 0 : i32
    return %c0_i32, %c0_i32_0 : i32, i32
  }
  func.func @transform_4(%arg0: i32) -> (i32, i32) {
    %c0_i32 = arith.constant 0 : i32
    %c0_i32_0 = arith.constant 0 : i32
    %c0_i32_1 = arith.constant 0 : i32
    return %c0_i32, %c0_i32_0 : i32, i32
  }
  func.func @transform_5(%arg0: i32) -> (i32, i32) {
    %c0_i32 = arith.constant 0 : i32
    %c0_i32_0 = arith.constant 0 : i32
    %c0_i32_1 = arith.constant 0 : i32
    return %c0_i32, %c0_i32_0 : i32, i32
  }
}

</mosaic_0001>

<bundles_post_ra>
// kernel: tpu_custom_call.1
= control target key start
LH: loop header
LB: loop body
LE: loop exit
PB: predicated region body
PF: predicated region fallthrough
CT: control target
= control target key end

     0   :  { %11 = vsyncpa [#allocation5], 0  ;;  %s1370_s0 = inlined_call_operand.hbm [shape: bf16[512,128], index: 0, kind: input, shape index: {}]   ;;  %s1371_s1 = inlined_call_operand.hbm [shape: bf16[128,128], index: 1, kind: input, shape index: {}]   ;;  %s1372_s2 = inlined_call_operand.vmem [shape: f32[1,128], index: 2, kind: input, shape index: {}]   ;;  %s1373_s3 = inlined_call_operand.vmem [shape: f32[1,128], index: 3, kind: input, shape index: {}]   ;;  %s1374_s4 = inlined_call_operand.hbm [shape: f32[1,128], index: 4, kind: output, shape index: {0}]   ;;  %s1375_s5 = inlined_call_operand.hbm [shape: f32[1,128], index: 5, kind: output, shape index: {1}]  }
   0x1   :  { %12 = vsyncpa [#allocation8], 0 }
   0x2   :  { %13 = vsyncpa [#allocation6], 0 }
   0x3   :  { %14 = vsyncpa [#allocation11], 0  ;;  %s1235_s18 = smov [#allocation4]  }
   0x4   :  { %s20_s19 = sshll.u32 %s1235_s18, 4  ;;  %s21_s19 = int_to_ptr.vmem [resolvable:$true] %s20_s19 }
   0x5   :  { %s1155_s20 = scalar_lea.vmem %s21_s19, 4096  ;;  %p1160_p1 = scmp.lt.s32.totalorder %s21_s19, %s21_s19 }
   0x6   :  { %p1156_p0 = scmp.ne.s32.totalorder %s21_s19, %s1155_s20  ;;  %p1161_p2 = scmp.lt.s32.totalorder %s1155_s20, %s1155_s20 }
   0x8   :  { %p1162_p3 = por %p1161_p2, %p1160_p1 }
   0xa   :  { %p1163_p4 = pnand %p1162_p3, %p1156_p0 }
   0xc   :  { %1166 = shalt.err (!%p1163_p4)
}
   0xd   :  { %s1236_s21 = smov 64   ;;  %s1237_s22 = smov 4  }
   0xe   :  { %26 = dma.hbm_to_vmem [thread:$0]  %s1370_s0, 4096, %s21_s19, [#allocation5], %s1236_s21, %s1236_s21, %s1237_s22  }
   0xf   :  { %s1238_s25 = smov [#allocation7]  }
  0x10   :  { %s32_s26 = sshll.u32 %s1238_s25, 4  ;;  %s33_s26 = int_to_ptr.vmem [resolvable:$true] %s32_s26 }
  0x11   :  { %s1175_s27 = scalar_lea.vmem %s33_s26, 1024  ;;  %p1180_p6 = scmp.lt.s32.totalorder %s33_s26, %s33_s26 }
  0x12   :  { %p1176_p5 = scmp.ne.s32.totalorder %s33_s26, %s1175_s27  ;;  %p1181_p7 = scmp.lt.s32.totalorder %s1175_s27, %s1175_s27 }
  0x14   :  { %p1182_p8 = por %p1181_p7, %p1180_p6 }
  0x16   :  { %p1183_p9 = pnand %p1182_p8, %p1176_p5 }
  0x18   :  { %1186 = shalt.err (!%p1183_p9)
}
  0x19   :  { %38 = dma.hbm_to_vmem [thread:$0]  %s1371_s1, 1024, %s33_s26, [#allocation8], %s1236_s21, %s1236_s21, %s1237_s22  }
  0x1a   :  { %1227 = dma.done.wait [#allocation5], 4096  }
  0x1b   :  { %1228 = vsyncadd [#allocation5], 4294963200 }
  0x1c   :  { %1229 = dma.done.wait [#allocation8], 1024  }
  0x1d   :  { %1230 = vsyncadd [#allocation8], 4294966272  ;;  %v1105_v0 = vld [vmem:[#allocation7 + $0x38] sm:$0xff]   ;;  %v1106_v1 = vld [vmem:[#allocation7 + $0x30] sm:$0xff]   ;;  %v1239_v42 = vmov 0.0   ;;  %s1240_s30 = smov [#allocation9]  }
  0x1e   :  { %1002 = vmatprep.subr.bf16.mxu0 %v1105_v0  ;;  %1082 = vmatprep.subr.bf16.mxu1 %v1105_v0  ;;  %v1107_v2 = vld [vmem:[#allocation7 + $0x28] sm:$0xff]   ;;  %v1108_v3 = vld [vmem:[#allocation7 + $0x20] sm:$0xff]   ;;  %v1109_v5 = vld [vmem:[#allocation7 + $0x18] sm:$0xff]   ;;  %54 = vst [vmem:[#allocation2] sm:$0x1] %v1239_v42  ;;  %s898_s6 = sshll.u32 %s1240_s30, 4  ;;  %s899_s6 = int_to_ptr.vmem [resolvable:$true] %s898_s6 }
  0x1f   :  { %1003 = vmatpush3.bf16.msra.mxu0 %v1105_v0  ;;  %1090 = vmatpush3.bf16.msra.mxu1 %v1105_v0  ;;  %v1113_v4 = vld [vmem:[#allocation4] sm:$0xff]   ;;  %v1110_v6 = vld [vmem:[#allocation7 + $0x10] sm:$0xff]   ;;  %v1111_v7 = vld [vmem:[#allocation7 + $0x8] sm:$0xff]   ;;  %55 = vst [vmem:[#allocation3] sm:$0x1] %v1239_v42  ;;  %s1241_s9 = smov [#allocation10]   ;;  %p1192_p11 = scmp.lt.s32.totalorder %s899_s6, %s899_s6 }
  0x20   :  { %1004 = vmatprep.subr.bf16.mxu0 %v1106_v1  ;;  %1083 = vmatprep.subr.bf16.mxu1 %v1106_v1  ;;  %v1112_v8 = vld [vmem:[#allocation7] sm:$0xff]   ;;  %v1114_v10 = vld [vmem:[#allocation4 + $0x8] sm:$0xff]   ;;  %v1115_v11 = vld [vmem:[#allocation4 + $0x10] sm:$0xff]   ;;  %s908_s10 = sshll.u32 %s1241_s9, 4  ;;  %s1187_s11 = scalar_lea.vmem %s899_s6, 16  ;;  %s909_s10 = int_to_ptr.vmem [resolvable:$true] %s908_s10 }
  0x21   :  { %1018 = vmatprep.mubr.bf16.mxu0 %v1113_v4  ;;  %v1129_v9 = vld [vmem:[#allocation4 + $0x80] sm:$0xff]   ;;  %v1130_v12 = vld [vmem:[#allocation4 + $0x88] sm:$0xff]   ;;  %v1131_v13 = vld [vmem:[#allocation4 + $0x90] sm:$0xff]   ;;  %p1188_p10 = scmp.ne.s32.totalorder %s899_s6, %s1187_s11  ;;  %s1191_s12 = scalar_lea.vmem %s899_s6, 32 }
  0x22   :  { %1050 = vmatprep.mubr.bf16.mxu1 %v1129_v9  ;;  %v1116_v14 = vld [vmem:[#allocation4 + $0x18] sm:$0xff]   ;;  %v1117_v15 = vld [vmem:[#allocation4 + $0x20] sm:$0xff]   ;;  %v1118_v18 = vld [vmem:[#allocation4 + $0x28] sm:$0xff]   ;;  %p1193_p12 = scmp.lt.s32.totalorder %s1191_s12, %s1187_s11 }
  0x23   :  { %1005 = vmatpush3.bf16.msra.mxu0 %v1106_v1  ;;  %1091 = vmatpush3.bf16.msra.mxu1 %v1106_v1  ;;  %v1132_v16 = vld [vmem:[#allocation4 + $0x98] sm:$0xff]   ;;  %v1133_v17 = vld [vmem:[#allocation4 + $0xa0] sm:$0xff]   ;;  %v1134_v19 = vld [vmem:[#allocation4 + $0xa8] sm:$0xff]  }
  0x24   :  { %1006 = vmatprep.subr.bf16.mxu0 %v1107_v2  ;;  %1084 = vmatprep.subr.bf16.mxu1 %v1107_v2  ;;  %v1119_v20 = vld [vmem:[#allocation4 + $0x30] sm:$0xff]   ;;  %v1120_v22 = vld [vmem:[#allocation4 + $0x38] sm:$0xff]   ;;  %v1121_v24 = vld [vmem:[#allocation4 + $0x40] sm:$0xff]   ;;  %p1194_p13 = por %p1193_p12, %p1192_p11 }
  0x25   :  { %v1135_v21 = vld [vmem:[#allocation4 + $0xb0] sm:$0xff]   ;;  %v1136_v23 = vld [vmem:[#allocation4 + $0xb8] sm:$0xff]   ;;  %v1137_v25 = vld [vmem:[#allocation4 + $0xc0] sm:$0xff]  }
  0x26   :  { %v1122_v26 = vld [vmem:[#allocation4 + $0x48] sm:$0xff]   ;;  %v1123_v28 = vld [vmem:[#allocation4 + $0x50] sm:$0xff]   ;;  %v1124_v30 = vld [vmem:[#allocation4 + $0x58] sm:$0xff]   ;;  %p1195_p0 = pnand %p1194_p13, %p1188_p10 }
  0x27   :  { %1007 = vmatpush3.bf16.msra.mxu0 %v1107_v2  ;;  %1092 = vmatpush3.bf16.msra.mxu1 %v1107_v2  ;;  %v1138_v27 = vld [vmem:[#allocation4 + $0xc8] sm:$0xff]   ;;  %v1139_v29 = vld [vmem:[#allocation4 + $0xd0] sm:$0xff]   ;;  %v1140_v31 = vld [vmem:[#allocation4 + $0xd8] sm:$0xff]  }
  0x28   :  { %1008 = vmatprep.subr.bf16.mxu0 %v1108_v3  ;;  %1085 = vmatprep.subr.bf16.mxu1 %v1108_v3  ;;  %v1125_v32 = vld [vmem:[#allocation4 + $0x60] sm:$0xff]   ;;  %v1126_v34 = vld [vmem:[#allocation4 + $0x68] sm:$0xff]   ;;  %v1127_v36 = vld [vmem:[#allocation4 + $0x70] sm:$0xff]  }
  0x29   :  { %v1141_v33 = vld [vmem:[#allocation4 + $0xe0] sm:$0xff]   ;;  %v1142_v35 = vld [vmem:[#allocation4 + $0xe8] sm:$0xff]   ;;  %v1143_v37 = vld [vmem:[#allocation4 + $0xf0] sm:$0xff]  }
  0x2a   :  { %v1128_v38 = vld [vmem:[#allocation4 + $0x78] sm:$0xff]  }
  0x2b   :  { %1009 = vmatpush3.bf16.msra.mxu0 %v1108_v3  ;;  %1093 = vmatpush3.bf16.msra.mxu1 %v1108_v3  ;;  %v1144_v39 = vld [vmem:[#allocation4 + $0xf8] sm:$0xff]  }
  0x2c   :  { %1010 = vmatprep.subr.bf16.mxu0 %v1109_v5  ;;  %1086 = vmatprep.subr.bf16.mxu1 %v1109_v5 }
  0x2f   :  { %1011 = vmatpush3.bf16.msra.mxu0 %v1109_v5  ;;  %1094 = vmatpush3.bf16.msra.mxu1 %v1109_v5 }
  0x30   :  { %1012 = vmatprep.subr.bf16.mxu0 %v1110_v6  ;;  %1087 = vmatprep.subr.bf16.mxu1 %v1110_v6 }
  0x33   :  { %1013 = vmatpush3.bf16.msra.mxu0 %v1110_v6  ;;  %1095 = vmatpush3.bf16.msra.mxu1 %v1110_v6 }
  0x34   :  { %1014 = vmatprep.subr.bf16.mxu0 %v1111_v7  ;;  %1088 = vmatprep.subr.bf16.mxu1 %v1111_v7 }
  0x37   :  { %1015 = vmatpush3.bf16.msra.mxu0 %v1111_v7  ;;  %1096 = vmatpush3.bf16.msra.mxu1 %v1111_v7 }
  0x38   :  { %1016 = vmatprep.subr.bf16.mxu0 %v1112_v8  ;;  %1089 = vmatprep.subr.bf16.mxu1 %v1112_v8 }
  0x3b   :  { %1017 = vmatpush3.bf16.msra.mxu0 %v1112_v8  ;;  %1097 = vmatpush3.bf16.msra.mxu1 %v1112_v8 }
  0x3e   :  { %1019 = vmatmul.mubr.bf16.vlgmr.msra.gmra.mxu0 %v1114_v10  ;;  %1051 = vmatmul.mubr.bf16.vlgmr.msra.gmra.mxu1 %v1130_v12 }
  0x3f   :  { %1022 = vmatprep.mubr.bf16.mxu0 %v1115_v11  ;;  %1054 = vmatprep.mubr.bf16.mxu1 %v1131_v13 }
  0x46   :  { %1023 = vmatmul.mubr.bf16.gmra.mxu0 %v1116_v14  ;;  %1055 = vmatmul.mubr.bf16.gmra.mxu1 %v1132_v16 }
  0x47   :  { %1026 = vmatprep.mubr.bf16.mxu0 %v1117_v15  ;;  %1058 = vmatprep.mubr.bf16.mxu1 %v1133_v17 }
  0x4e   :  { %1027 = vmatmul.mubr.bf16.gmra.mxu0 %v1118_v18  ;;  %1059 = vmatmul.mubr.bf16.gmra.mxu1 %v1134_v19 }
  0x4f   :  { %1030 = vmatprep.mubr.bf16.mxu0 %v1119_v20  ;;  %1062 = vmatprep.mubr.bf16.mxu1 %v1135_v21 }
  0x56   :  { %1031 = vmatmul.mubr.bf16.gmra.mxu0 %v1120_v22  ;;  %1063 = vmatmul.mubr.bf16.gmra.mxu1 %v1136_v23 }
  0x57   :  { %1034 = vmatprep.mubr.bf16.mxu0 %v1121_v24  ;;  %1066 = vmatprep.mubr.bf16.mxu1 %v1137_v25 }
  0x5e   :  { %1035 = vmatmul.mubr.bf16.gmra.mxu0 %v1122_v26  ;;  %1067 = vmatmul.mubr.bf16.gmra.mxu1 %v1138_v27 }
  0x5f   :  { %1038 = vmatprep.mubr.bf16.mxu0 %v1123_v28  ;;  %1070 = vmatprep.mubr.bf16.mxu1 %v1139_v29 }
  0x66   :  { %1039 = vmatmul.mubr.bf16.gmra.mxu0 %v1124_v30  ;;  %1071 = vmatmul.mubr.bf16.gmra.mxu1 %v1140_v31 }
  0x67   :  { %1042 = vmatprep.mubr.bf16.mxu0 %v1125_v32  ;;  %1074 = vmatprep.mubr.bf16.mxu1 %v1141_v33 }
  0x6e   :  { %1043 = vmatmul.mubr.bf16.gmra.mxu0 %v1126_v34  ;;  %1075 = vmatmul.mubr.bf16.gmra.mxu1 %v1142_v35 }
  0x6f   :  { %1046 = vmatprep.mubr.bf16.mxu0 %v1127_v36  ;;  %1078 = vmatprep.mubr.bf16.mxu1 %v1143_v37 }
  0x76   :  { %1047 = vmatmul.mubr.bf16.gmra.mxu0 %v1128_v38  ;;  %1079 = vmatmul.mubr.bf16.gmra.mxu1 %v1144_v39 }
  0xfe   :  { %v1020_v40 = vpop.f32.mrf.mxu0  ;;  %v1278_v41 = vpop.f32.mrf.mxu1 }
  0xff   :  { %v740_v52 = vmul.f32 %v1020_v40, %v1020_v40 }
 0x100   :  { %v410_v43 = vpop.f32.mrf.mxu0  ;;  %v1280_v45 = vpop.f32.mrf.mxu1 }
 0x101   :  { %v738_v47 = vmul.f32 %v410_v43, %v410_v43 }
 0x102   :  { %v1021_v44 = vpop.f32.mrf.mxu0  ;;  %v1282_v51 = vpop.f32.mrf.mxu1 }
 0x103   :  { %v741_v56 = vmul.f32 %v1021_v44, %v1021_v44 }
 0x104   :  { %v413_v46 = vpop.f32.mrf.mxu0  ;;  %v1284_v60 = vpop.f32.mrf.mxu1 }
 0x105   :  { %v666_v48 = vadd.f32 %v413_v46, %v410_v43  ;;  %v739_v49 = vmul.f32 %v413_v46, %v413_v46 }
 0x106   :  { %v1024_v50 = vpop.f32.mrf.mxu0  ;;  %v1286_v5 = vpop.f32.mrf.mxu1 }
 0x107   :  { %v667_v53 = vadd.f32 %v1020_v40, %v666_v48  ;;  %v802_v54 = vadd.f32 %v739_v49, %v738_v47  ;;  %v744_v6 = vmul.f32 %v1024_v50, %v1024_v50 }
 0x108   :  { %v426_v55 = vpop.f32.mrf.mxu0  ;;  %v1288_v14 = vpop.f32.mrf.mxu1 }
 0x109   :  { %v803_v57 = vadd.f32 %v802_v54, %v740_v52  ;;  %v668_v58 = vadd.f32 %v1021_v44, %v667_v53  ;;  %v742_v62 = vmul.f32 %v426_v55, %v426_v55 }
 0x10a   :  { %v1025_v59 = vpop.f32.mrf.mxu0  ;;  %v1290_v23 = vpop.f32.mrf.mxu1 }
 0x10b   :  { %v669_v61 = vadd.f32 %v668_v58, %v426_v55  ;;  %v804_v63 = vadd.f32 %v803_v57, %v741_v56  ;;  %v745_v10 = vmul.f32 %v1025_v59, %v1025_v59 }
 0x10c   :  { %v429_v0 = vpop.f32.mrf.mxu0  ;;  %v1292_v32 = vpop.f32.mrf.mxu1 }
 0x10d   :  { %v805_v1 = vadd.f32 %v804_v63, %v742_v62  ;;  %v670_v2 = vadd.f32 %v669_v61, %v429_v0  ;;  %v743_v3 = vmul.f32 %v429_v0, %v429_v0 }
 0x10e   :  { %v1028_v4 = vpop.f32.mrf.mxu0  ;;  %v1294_v42 = vpop.f32.mrf.mxu1 }
 0x10f   :  { %v671_v7 = vadd.f32 %v1024_v50, %v670_v2  ;;  %v806_v8 = vadd.f32 %v805_v1, %v743_v3  ;;  %v748_v24 = vmul.f32 %v1028_v4, %v1028_v4 }
 0x110   :  { %v442_v9 = vpop.f32.mrf.mxu0  ;;  %v1296_v53 = vpop.f32.mrf.mxu1 }
 0x111   :  { %v807_v11 = vadd.f32 %v806_v8, %v744_v6  ;;  %v672_v12 = vadd.f32 %v1025_v59, %v671_v7  ;;  %v746_v16 = vmul.f32 %v442_v9, %v442_v9 }
 0x112   :  { %v1029_v13 = vpop.f32.mrf.mxu0  ;;  %v1298_v63 = vpop.f32.mrf.mxu1 }
 0x113   :  { %v673_v15 = vadd.f32 %v672_v12, %v442_v9  ;;  %v808_v17 = vadd.f32 %v807_v11, %v745_v10  ;;  %v749_v28 = vmul.f32 %v1029_v13, %v1029_v13 }
 0x114   :  { %v445_v18 = vpop.f32.mrf.mxu0  ;;  %v1300_v9 = vpop.f32.mrf.mxu1 }
 0x115   :  { %v809_v19 = vadd.f32 %v808_v17, %v746_v16  ;;  %v674_v20 = vadd.f32 %v673_v15, %v445_v18  ;;  %v747_v21 = vmul.f32 %v445_v18, %v445_v18 }
 0x116   :  { %v1032_v22 = vpop.f32.mrf.mxu0 }
 0x117   :  { %v675_v25 = vadd.f32 %v1028_v4, %v674_v20  ;;  %v810_v26 = vadd.f32 %v809_v19, %v747_v21  ;;  %v752_v43 = vmul.f32 %v1032_v22, %v1032_v22  ;;  %v1302_v19 = vpop.f32.mrf.mxu1 }
 0x118   :  { %v458_v27 = vpop.f32.mrf.mxu0 }
 0x119   :  { %v811_v29 = vadd.f32 %v810_v26, %v748_v24  ;;  %v676_v30 = vadd.f32 %v1029_v13, %v675_v25  ;;  %v750_v34 = vmul.f32 %v458_v27, %v458_v27 }
 0x11a   :  { %v1033_v31 = vpop.f32.mrf.mxu0 }
 0x11b   :  { %v677_v33 = vadd.f32 %v676_v30, %v458_v27  ;;  %v812_v35 = vadd.f32 %v811_v29, %v749_v28  ;;  %v753_v48 = vmul.f32 %v1033_v31, %v1033_v31  ;;  %v1304_v29 = vpop.f32.mrf.mxu1 }
 0x11c   :  { %v461_v36 = vpop.f32.mrf.mxu0 }
 0x11d   :  { %v813_v37 = vadd.f32 %v812_v35, %v750_v34  ;;  %v678_v38 = vadd.f32 %v677_v33, %v461_v36  ;;  %v751_v39 = vmul.f32 %v461_v36, %v461_v36 }
 0x11e   :  { %v1036_v40 = vpop.f32.mrf.mxu0 }
 0x11f   :  { %v679_v44 = vadd.f32 %v1032_v22, %v678_v38  ;;  %v814_v46 = vadd.f32 %v813_v37, %v751_v39  ;;  %v756_v0 = vmul.f32 %v1036_v40, %v1036_v40  ;;  %v1306_v39 = vpop.f32.mrf.mxu1 }
 0x120   :  { %v474_v47 = vpop.f32.mrf.mxu0 }
 0x121   :  { %v815_v49 = vadd.f32 %v814_v46, %v752_v43  ;;  %v680_v50 = vadd.f32 %v1033_v31, %v679_v44  ;;  %v754_v55 = vmul.f32 %v474_v47, %v474_v47 }
 0x122   :  { %v1037_v52 = vpop.f32.mrf.mxu0 }
 0x123   :  { %v681_v54 = vadd.f32 %v680_v50, %v474_v47  ;;  %v816_v56 = vadd.f32 %v815_v49, %v753_v48  ;;  %v757_v4 = vmul.f32 %v1037_v52, %v1037_v52 }
 0x124   :  { %v477_v57 = vpop.f32.mrf.mxu0 }
 0x125   :  { %v817_v58 = vadd.f32 %v816_v56, %v754_v55  ;;  %v682_v59 = vadd.f32 %v681_v54, %v477_v57  ;;  %v755_v61 = vmul.f32 %v477_v57, %v477_v57 }
 0x126   :  { %v1040_v62 = vpop.f32.mrf.mxu0 }
 0x127   :  { %v683_v1 = vadd.f32 %v1036_v40, %v682_v59  ;;  %v818_v2 = vadd.f32 %v817_v58, %v755_v61  ;;  %v760_v20 = vmul.f32 %v1040_v62, %v1040_v62 }
 0x128   :  { %v490_v3 = vpop.f32.mrf.mxu0 }
 0x129   :  { %v819_v6 = vadd.f32 %v818_v2, %v756_v0  ;;  %v684_v7 = vadd.f32 %v1037_v52, %v683_v1  ;;  %v758_v11 = vmul.f32 %v490_v3, %v490_v3  ;;  %v589_v52 = vpop.f32.mrf.mxu1 }
 0x12a   :  { %v1041_v8 = vpop.f32.mrf.mxu0 }
 0x12b   :  { %v685_v10 = vadd.f32 %v684_v7, %v490_v3  ;;  %v820_v12 = vadd.f32 %v819_v6, %v757_v4  ;;  %v761_v25 = vmul.f32 %v1041_v8, %v1041_v8 }
 0x12c   :  { %v493_v13 = vpop.f32.mrf.mxu0 }
 0x12d   :  { %v821_v15 = vadd.f32 %v820_v12, %v758_v11  ;;  %v686_v16 = vadd.f32 %v685_v10, %v493_v13  ;;  %v759_v17 = vmul.f32 %v493_v13, %v493_v13  ;;  %v771_v13 = vmul.f32 %v1284_v60, %v1284_v60 }
 0x12e   :  { %v1044_v18 = vpop.f32.mrf.mxu0 }
 0x12f   :  { %v687_v21 = vadd.f32 %v1040_v62, %v686_v16  ;;  %v822_v22 = vadd.f32 %v821_v15, %v759_v17  ;;  %v764_v40 = vmul.f32 %v1044_v18, %v1044_v18  ;;  %v1308_v62 = vpop.f32.mrf.mxu1  ;;  %v772_v17 = vmul.f32 %v1278_v41, %v1278_v41 }
 0x130   :  { %v506_v24 = vpop.f32.mrf.mxu0 }
 0x131   :  { %v823_v26 = vadd.f32 %v822_v22, %v760_v20  ;;  %v688_v27 = vadd.f32 %v1041_v8, %v687_v21  ;;  %v762_v31 = vmul.f32 %v506_v24, %v506_v24  ;;  %v602_v7 = vpop.f32.mrf.mxu1  ;;  %v770_v8 = vmul.f32 %v1280_v45, %v1280_v45 }
 0x132   :  { %v1045_v28 = vpop.f32.mrf.mxu0  ;;  %v773_v21 = vmul.f32 %v1282_v51, %v1282_v51 }
 0x133   :  { %v689_v30 = vadd.f32 %v688_v27, %v506_v24  ;;  %v824_v33 = vadd.f32 %v823_v26, %v761_v25  ;;  %v765_v47 = vmul.f32 %v1045_v28, %v1045_v28  ;;  %v1069_v16 = vpop.f32.mrf.mxu1 }
 0x134   :  { %v509_v34 = vpop.f32.mrf.mxu0 }
 0x135   :  { %v825_v35 = vadd.f32 %v824_v33, %v762_v31  ;;  %v690_v36 = vadd.f32 %v689_v30, %v509_v34  ;;  %v763_v37 = vmul.f32 %v509_v34, %v509_v34  ;;  %v776_v31 = vmul.f32 %v1286_v5, %v1286_v5 }
 0x136   :  { %v1048_v38 = vpop.f32.mrf.mxu0  ;;  %v777_v34 = vmul.f32 %v1290_v23, %v1290_v23 }
 0x137   :  { %v691_v43 = vadd.f32 %v1044_v18, %v690_v36  ;;  %v826_v44 = vadd.f32 %v825_v35, %v763_v37  ;;  %v768_v0 = vmul.f32 %v1048_v38, %v1048_v38 }
 0x138   :  { %v522_v46 = vpop.f32.mrf.mxu0 }
 0x139   :  { %v827_v48 = vadd.f32 %v826_v44, %v764_v40  ;;  %v692_v49 = vadd.f32 %v1045_v28, %v691_v43  ;;  %v766_v55 = vmul.f32 %v522_v46, %v522_v46 }
 0x13a   :  { %v1049_v50 = vpop.f32.mrf.mxu0 }
 0x13b   :  { %v693_v54 = vadd.f32 %v692_v49, %v522_v46  ;;  %v828_v56 = vadd.f32 %v827_v48, %v765_v47  ;;  %v769_v3 = vmul.f32 %v1049_v50, %v1049_v50  ;;  %v780_v46 = vmul.f32 %v1294_v42, %v1294_v42 }
 0x13c   :  { %v525_v57 = vpop.f32.mrf.mxu0  ;;  %v781_v48 = vmul.f32 %v1298_v63, %v1298_v63 }
 0x13d   :  { %v829_v58 = vadd.f32 %v828_v56, %v766_v55  ;;  %v694_v59 = vadd.f32 %v693_v54, %v525_v57  ;;  %v767_v61 = vmul.f32 %v525_v57, %v525_v57  ;;  %v782_v55 = vmul.f32 %v1304_v29, %v1304_v29 }
 0x13f   :  { %v695_v1 = vadd.f32 %v1048_v38, %v694_v59  ;;  %v830_v2 = vadd.f32 %v829_v58, %v767_v61  ;;  %v778_v38 = vmul.f32 %v1296_v53, %v1296_v53  ;;  %v783_v58 = vmul.f32 %v589_v52, %v589_v52 }
 0x141   :  { %v696_v4 = vadd.f32 %v1049_v50, %v695_v1  ;;  %v831_v6 = vadd.f32 %v830_v2, %v768_v0 }
 0x143   :  { %v832_v10 = vadd.f32 %v831_v6, %v769_v3  ;;  %v697_v11 = vadd.f32 %v696_v4, %v1280_v45  ;;  %v605_v45 = vpop.f32.mrf.mxu1 }
 0x145   :  { %v698_v12 = vadd.f32 %v697_v11, %v1284_v60  ;;  %v833_v15 = vadd.f32 %v832_v10, %v770_v8  ;;  %v774_v60 = vmul.f32 %v1288_v14, %v1288_v14  ;;  %v1072_v30 = vpop.f32.mrf.mxu1 }
 0x147   :  { %v699_v18 = vadd.f32 %v1278_v41, %v698_v12  ;;  %v834_v20 = vadd.f32 %v833_v15, %v771_v13  ;;  %v775_v41 = vmul.f32 %v1292_v32, %v1292_v32  ;;  %v618_v36 = vpop.f32.mrf.mxu1  ;;  %v788_v12 = vmul.f32 %v1308_v62, %v1308_v62 }
 0x148   :  { %v789_v15 = vmul.f32 %v1069_v16, %v1069_v16 }
 0x149   :  { %v835_v22 = vadd.f32 %v834_v20, %v772_v17  ;;  %v700_v24 = vadd.f32 %v1282_v51, %v699_v18  ;;  %v1073_v44 = vpop.f32.mrf.mxu1 }
 0x14b   :  { %v701_v25 = vadd.f32 %v700_v24, %v1288_v14  ;;  %v836_v26 = vadd.f32 %v835_v22, %v773_v21  ;;  %v621_v50 = vpop.f32.mrf.mxu1 }
 0x14d   :  { %v837_v27 = vadd.f32 %v836_v26, %v774_v60  ;;  %v702_v28 = vadd.f32 %v701_v25, %v1292_v32  ;;  %v1076_v59 = vpop.f32.mrf.mxu1  ;;  %v791_v25 = vmul.f32 %v621_v50, %v621_v50  ;;  %v792_v26 = vmul.f32 %v1072_v30, %v1072_v30 }
 0x14f   :  { %v703_v33 = vadd.f32 %v1286_v5, %v702_v28  ;;  %v838_v51 = vadd.f32 %v837_v27, %v775_v41  ;;  %v779_v5 = vmul.f32 %v1300_v9, %v1300_v9  ;;  %v634_v3 = vpop.f32.mrf.mxu1  ;;  %v793_v28 = vmul.f32 %v1073_v44, %v1073_v44 }
 0x151   :  { %v839_v35 = vadd.f32 %v838_v51, %v776_v31  ;;  %v704_v14 = vadd.f32 %v1290_v23, %v703_v33  ;;  %v1077_v11 = vpop.f32.mrf.mxu1  ;;  %v794_v51 = vmul.f32 %v634_v3, %v634_v3 }
 0x153   :  { %v705_v37 = vadd.f32 %v704_v14, %v1296_v53  ;;  %v840_v32 = vadd.f32 %v839_v35, %v777_v34  ;;  %v637_v20 = vpop.f32.mrf.mxu1 }
 0x154   :  { %v795_v14 = vmul.f32 %v637_v20, %v637_v20 }
 0x155   :  { %v841_v40 = vadd.f32 %v840_v32, %v778_v38  ;;  %v706_v43 = vadd.f32 %v705_v37, %v1300_v9  ;;  %v1080_v60 = vpop.f32.mrf.mxu1 }
 0x157   :  { %v707_v47 = vadd.f32 %v1294_v42, %v706_v43  ;;  %v842_v23 = vadd.f32 %v841_v40, %v779_v5  ;;  %v784_v42 = vmul.f32 %v1302_v19, %v1302_v19  ;;  %v650_v33 = vpop.f32.mrf.mxu1  ;;  %v797_v40 = vmul.f32 %v1077_v11, %v1077_v11 }
 0x159   :  { %v843_v49 = vadd.f32 %v842_v23, %v780_v46  ;;  %v708_v53 = vadd.f32 %v1298_v63, %v707_v47  ;;  %v785_v63 = vmul.f32 %v1306_v39, %v1306_v39  ;;  %v1081_v37 = vpop.f32.mrf.mxu1  ;;  %v798_v47 = vmul.f32 %v650_v33, %v650_v33 }
 0x15b   :  { %v709_v54 = vadd.f32 %v708_v53, %v1304_v29  ;;  %v844_v9 = vadd.f32 %v843_v49, %v781_v48  ;;  %v786_v29 = vmul.f32 %v602_v7, %v602_v7  ;;  %v653_v46 = vpop.f32.mrf.mxu1  ;;  %v800_v53 = vmul.f32 %v1080_v60, %v1080_v60 }
 0x15c   :  { %v799_v49 = vmul.f32 %v653_v46, %v653_v46 }
 0x15d   :  { %v845_v56 = vadd.f32 %v844_v9, %v782_v55  ;;  %v710_v57 = vadd.f32 %v709_v54, %v589_v52  ;;  %v787_v52 = vmul.f32 %v605_v45, %v605_v45  ;;  %v801_v55 = vmul.f32 %v1081_v37, %v1081_v37 }
 0x15f   :  { %v711_v61 = vadd.f32 %v1302_v19, %v710_v57  ;;  %v846_v0 = vadd.f32 %v845_v56, %v783_v58 }
 0x161   :  { %v847_v1 = vadd.f32 %v846_v0, %v784_v42  ;;  %v712_v2 = vadd.f32 %v1306_v39, %v711_v61  ;;  %v790_v39 = vmul.f32 %v618_v36, %v618_v36 }
 0x163   :  { %v713_v4 = vadd.f32 %v712_v2, %v602_v7  ;;  %v848_v6 = vadd.f32 %v847_v1, %v785_v63 }
 0x165   :  { %v849_v8 = vadd.f32 %v848_v6, %v786_v29  ;;  %v714_v10 = vadd.f32 %v713_v4, %v605_v45  ;;  %v665_v4 = vld [vmem:[#allocation2] sm:$0x1] }
 0x167   :  { %v715_v19 = vadd.f32 %v1308_v62, %v714_v10  ;;  %v850_v13 = vadd.f32 %v849_v8, %v787_v52  ;;  %v737_v8 = vld [vmem:[#allocation3] sm:$0x1] }
 0x169   :  { %v851_v17 = vadd.f32 %v850_v13, %v788_v12  ;;  %v716_v18 = vadd.f32 %v1069_v16, %v715_v19 }
 0x16b   :  { %v717_v21 = vadd.f32 %v716_v18, %v618_v36  ;;  %v852_v22 = vadd.f32 %v851_v17, %v789_v15  ;;  %v796_v36 = vmul.f32 %v1076_v59, %v1076_v59 }
 0x16d   :  { %v853_v24 = vadd.f32 %v852_v22, %v790_v39  ;;  %v718_v7 = vadd.f32 %v717_v21, %v621_v50  ;;  %v883_v39 = vld [vmem:[%s1372_s2] sm:$0x1] }
 0x16f   :  { %v719_v45 = vadd.f32 %v1072_v30, %v718_v7  ;;  %v854_v27 = vadd.f32 %v853_v24, %v791_v25  ;;  %v888_v7 = vld [vmem:[%s1373_s3] sm:$0x1] }
 0x171   :  { %v855_v41 = vadd.f32 %v854_v27, %v792_v26  ;;  %v720_v31 = vadd.f32 %v1073_v44, %v719_v45 }
 0x173   :  { %v721_v62 = vadd.f32 %v720_v31, %v634_v3  ;;  %v856_v34 = vadd.f32 %v855_v41, %v793_v28 }
 0x175   :  { %v857_v35 = vadd.f32 %v856_v34, %v794_v51  ;;  %v722_v16 = vadd.f32 %v721_v62, %v637_v20 }
 0x177   :  { %v723_v38 = vadd.f32 %v1076_v59, %v722_v16  ;;  %v858_v32 = vadd.f32 %v857_v35, %v795_v14 }
 0x179   :  { %v859_v43 = vadd.f32 %v858_v32, %v796_v36  ;;  %v724_v5 = vadd.f32 %v1077_v11, %v723_v38 }
 0x17b   :  { %v725_v30 = vadd.f32 %v724_v5, %v650_v33  ;;  %v860_v23 = vadd.f32 %v859_v43, %v797_v40 }
 0x17d   :  { %v861_v48 = vadd.f32 %v860_v23, %v798_v47  ;;  %v726_v44 = vadd.f32 %v725_v30, %v653_v46 }
 0x17f   :  { %v727_v50 = vadd.f32 %v1080_v60, %v726_v44  ;;  %v862_v54 = vadd.f32 %v861_v48, %v799_v49 }
 0x181   :  { %v728_v9 = vadd.f32 %v1081_v37, %v727_v50  ;;  %v863_v56 = vadd.f32 %v862_v54, %v800_v53 }
 0x183   :  { %v729_v57 = vrot.slane %v728_v9, 4  ;;  %v864_v58 = vadd.f32 %v863_v56, %v801_v55 }
 0x185   :  { %v730_v59 = vadd.f32 %v729_v57, %v728_v9  ;;  %v865_v42 = vrot.slane %v864_v58, 4 }
 0x187   :  { %v731_v61 = vrot.slane %v730_v59, 2  ;;  %v866_v0 = vadd.f32 %v865_v42, %v864_v58 }
 0x189   :  { %v732_v63 = vadd.f32 %v731_v61, %v730_v59  ;;  %v867_v1 = vrot.slane %v866_v0, 2 }
 0x18b   :  { %v733_v2 = vrot.slane %v732_v63, 1  ;;  %v868_v3 = vadd.f32 %v867_v1, %v866_v0 }
 0x18d   :  { %v734_v29 = vadd.f32 %v733_v2, %v732_v63  ;;  %v869_v6 = vrot.slane %v868_v3, 1 }
 0x18f   :  { %v735_v10 = vadd.f32 %v734_v29, %v665_v4  ;;  %v870_v52 = vadd.f32 %v869_v6, %v868_v3 }
 0x191   :  { %736 = vst [vmem:[#allocation2] sm:$0x1] %v735_v10  ;;  %v871_v11 = vadd.f32 %v870_v52, %v737_v8 }
 0x193   :  { %872 = vst [vmem:[#allocation3] sm:$0x1] %v871_v11 }
 0x198   :  { %v876_v12 = vld [vmem:[#allocation2] sm:$0x1] }
 0x199   :  { %v877_v19 = vmul.f32 0.001953125, %v876_v12 }
 0x19a   :  { %v878_v13 = vld [vmem:[#allocation3] sm:$0x1] }
 0x19b   :  { %v879_v15 = vmul.f32 0.001953125, %v878_v13  ;;  %v880_v17 = vmul.f32 %v877_v19, %v877_v19 }
 0x19d   :  { %v881_v18 = vsub.f32 %v879_v15, %v880_v17 }
 0x19f   :  { %v882_v20 = vmax.f32 %v881_v18, 0.0 }
 0x1a1   :  { %v884_v21 = vadd.f32 1e-05, %v882_v20 }
 0x1a3   :  { %1145 = vrsqrt.f32 %v884_v21 }
 0x1b0   :  { %v1146_v22 = vpop.eup %1145 }
 0x1b1   :  { %v886_v24 = vmul.f32 %v1146_v22, %v883_v39 }
 0x1b3   :  { %887 = vst [vmem:[#allocation9] sm:$0x1] %v886_v24  ;;  %v889_v25 = vmul.f32 %v886_v24, %v877_v19 }
 0x1b4   :  { %1198 = shalt.err (!%p1195_p0)
}
 0x1b5   :  { %901 = dma.vmem_to_hbm [thread:$0]  %s899_s6, 16, %s1374_s4, [#allocation6]   ;;  %v890_v60 = vsub.f32 %v888_v7, %v889_v25 }
 0x1b6   :  { %s1207_s3 = scalar_lea.vmem %s909_s10, 16  ;;  %s1211_s14 = scalar_lea.vmem %s909_s10, 32 }
 0x1b7   :  { %891 = vst [vmem:[#allocation10] sm:$0x1] %v890_v60  ;;  %p1208_p1 = scmp.ne.s32.totalorder %s909_s10, %s1207_s3  ;;  %p1212_p2 = scmp.lt.s32.totalorder %s909_s10, %s909_s10 }
 0x1b8   :  { %p1213_p3 = scmp.lt.s32.totalorder %s1211_s14, %s1207_s3 }
 0x1ba   :  { %p1214_p4 = por %p1213_p3, %p1212_p2 }
 0x1bc   :  { %p1215_p5 = pnand %p1214_p4, %p1208_p1 }
 0x1be   :  { %1218 = shalt.err (!%p1215_p5)
}
 0x1bf   :  { %911 = dma.vmem_to_hbm [thread:$0]  %s909_s10, 16, %s1375_s5, [#allocation11]  }
 0x1c0   :  { %1231 = dma.done.wait [#allocation6], 16  }
 0x1c1   :  { %1232 = vsyncadd [#allocation6], 4294967280 }
 0x1c2   :  { %1233 = dma.done.wait [#allocation11], 16  }
 0x1c3   :  { %1234 = vsyncadd [#allocation11], 4294967280 }
 0x1c4   :  { %918 = vsyncpa [#allocation5], 1 }
 0x1c5   :  { %919 = vsyncpa [#allocation8], 1 }
 0x1c6   :  { %920 = vsyncpa [#allocation6], 1 }
 0x1c7   :  { %921 = vsyncpa [#allocation11], 1 }

</bundles_post_ra>
